<compile_context>
chip_gen: v7x
topology: tpu7x:2x2x1
jax: 0.10.0
libtpu: 0.0.40
codegen_flags: <defaults>
</compile_context>

<pallas_src>
import functools

import jax
import jax.numpy as jnp
from jax.experimental import pallas as pl
from jax.experimental.pallas import tpu as pltpu


def _round_up(v, m):
    return (v + m - 1) // m * m


def mlp_kernel(x_ref, w1_ref, b1_ref, w2_ref, b2_ref, w3_ref, b3_ref, o_ref):
    # x tile: (TBp, G*F) bf16 -- G batch rows packed per 128-lane row.
    # Layer 1 (block-diagonal): MXU matmul (bf16 in, f32 acc) + bias + ReLU.
    h = jnp.dot(x_ref[...], w1_ref[...], preferred_element_type=jnp.float32)
    h = jnp.maximum(h + b1_ref[...], 0.0)
    # Layer 2 (block-diagonal).
    h = jnp.dot(h.astype(jnp.bfloat16), w2_ref[...],
                preferred_element_type=jnp.float32)
    h = jnp.maximum(h + b2_ref[...], 0.0)
    # Output layer: block-diagonal (G*H2, G) matmul -> one output lane per packed
    # batch row; scalar bias from SMEM.
    y = jnp.dot(h.astype(jnp.bfloat16), w3_ref[...],
                preferred_element_type=jnp.float32)
    o_ref[...] = (y + b3_ref[0]).astype(o_ref.dtype)


def mlp_forward(x, params, *, block_batch=32768):
    """x: [B, F]. params: dict from init_params. Returns [B, 1] float32."""
    B, F = x.shape
    H1 = params["w1"].shape[1]
    H2 = params["w2"].shape[1]

    # --- batch-into-lanes packing factor ----------------------------------
    G = max(1, 128 // F)          # batch rows packed per 128-lane row
    quantum = 8 * G               # keeps the packed sublane dim a multiple of 8

    # --- weight prep (built once per call; tiny, fused by XLA) ------------
    bf16 = jnp.bfloat16
    eye = jnp.eye(G, dtype=jnp.float32)
    w1_bd = jnp.kron(eye, params["w1"]).astype(bf16)           # (G*F,  G*H1)
    w2_bd = jnp.kron(eye, params["w2"]).astype(bf16)           # (G*H1, G*H2)
    w3_bd = jnp.kron(eye, params["w3"].T).astype(bf16)         # (G*H2, G)
    b1_t = jnp.tile(params["b1"], (1, G))                      # (1, G*H1) f32
    b2_t = jnp.tile(params["b2"], (1, G))                      # (1, G*H2) f32
    b3 = params["b3"]                                          # (1,) f32 -> SMEM

    # --- batch tiling ------------------------------------------------------
    block_batch = max(quantum, _round_up(block_batch, quantum))
    Br = _round_up(max(B, 1), 2 * quantum)
    num_tiles = pl.cdiv(Br, block_batch)
    if num_tiles < 2:
        num_tiles = 2             # >= 2 grid tiles so v7x's two TCs both get work
    TB = _round_up(pl.cdiv(Br, num_tiles), quantum)
    num_tiles = pl.cdiv(Br, TB)
    Bp = num_tiles * TB           # padded batch (original rows)
    TBp = TB // G                 # packed rows per tile

    xb = x.astype(bf16)
    if Bp != B:
        xb = jnp.pad(xb, ((0, Bp - B), (0, 0)))
    x_packed = xb.reshape(Bp // G, G * F)       # free row-major view

    flops = 2 * Bp * (F * H1 + H1 * H2 + H2)
    bytes_accessed = (Bp * F * 2                                # x stream (bf16)
                      + (w1_bd.size + w2_bd.size + w3_bd.size) * 2
                      + (b1_t.size + b2_t.size + b3.size) * 4
                      + Bp * 4)                                 # output (f32)
    cost = pl.CostEstimate(flops=int(flops), transcendentals=0,
                           bytes_accessed=int(bytes_accessed))

    out = pl.pallas_call(
        mlp_kernel,
        out_shape=jax.ShapeDtypeStruct((Bp // G, G), jnp.float32),
        grid=(num_tiles,),
        in_specs=[
            pl.BlockSpec((TBp, G * F), lambda i: (i, 0)),       # x: streamed tiles
            pl.BlockSpec(w1_bd.shape, lambda i: (0, 0)),        # weights: VMEM-resident
            pl.BlockSpec(b1_t.shape, lambda i: (0, 0)),
            pl.BlockSpec(w2_bd.shape, lambda i: (0, 0)),
            pl.BlockSpec(b2_t.shape, lambda i: (0, 0)),
            pl.BlockSpec(w3_bd.shape, lambda i: (0, 0)),
            pl.BlockSpec(memory_space=pltpu.MemorySpace.SMEM),  # b3: scalar path
        ],
        out_specs=pl.BlockSpec((TBp, G), lambda i: (i, 0)),
        compiler_params=pltpu.CompilerParams(
            dimension_semantics=("parallel",),
            vmem_limit_bytes=32 * 1024 * 1024),
        cost_estimate=cost,
    )(x_packed, w1_bd, b1_t, w2_bd, b2_t, w3_bd, b3)

    # (Bp//G, G) row-major == batch order; drop padded rows.
    return out.reshape(Bp, 1)[:B]


def init_params(key, num_features, hidden_units):
    """Deterministic init mimicking nn.Linear default (uniform +-1/sqrt(fan_in)).

    Hidden-layer weights stored transposed to [in, out]; biases as [1, out].
    Output layer stored as a (1, H_last) row (PyTorch-native layout for
    Linear(H_last, 1)) plus a (1,) bias.
    """
    sizes = [num_features] + list(hidden_units) + [1]
    n_layers = len(sizes) - 1
    params = {}
    for li in range(n_layers):
        fan_in, fan_out = sizes[li], sizes[li + 1]
        key, kw, kb = jax.random.split(key, 3)
        bound = 1.0 / (fan_in ** 0.5)
        w = jax.random.uniform(kw, (fan_in, fan_out), jnp.float32, -bound, bound)
        b = jax.random.uniform(kb, (fan_out,), jnp.float32, -bound, bound)
        if li == n_layers - 1:
            params[f"w{li + 1}"] = w.T                 # (1, H_last)
            params[f"b{li + 1}"] = b                   # (1,)
        else:
            params[f"w{li + 1}"] = w                   # (fan_in, fan_out)
            params[f"b{li + 1}"] = b.reshape(1, fan_out)
    return params


def mlp_reference(x, params):
    """Pure-JAX reference matching the kernel's bf16-input / f32-accumulate math."""
    f32, bf = jnp.float32, jnp.bfloat16
    xq = x.astype(bf).astype(f32)
    w1 = params["w1"].astype(bf).astype(f32)
    w2 = params["w2"].astype(bf).astype(f32)
    w3 = params["w3"].astype(bf).astype(f32)
    h = jnp.maximum(xq @ w1 + params["b1"], 0.0)
    h = h.astype(bf).astype(f32)
    h = jnp.maximum(h @ w2 + params["b2"], 0.0)
    h = h.astype(bf).astype(f32)
    return h @ w3.T + params["b3"]


if __name__ == "__main__":
    num_features = 16
    hidden_units = [32, 32]
    batch = 8

    key = jax.random.PRNGKey(0)
    key, kx = jax.random.split(key)
    x = jax.random.normal(kx, (batch, num_features), jnp.float32)
    params = init_params(key, num_features, hidden_units)

    fwd = jax.jit(functools.partial(mlp_forward, block_batch=32768))
    y = jax.block_until_ready(fwd(x, params))

    y_ref = mlp_reference(x, params)
    assert y.shape == (batch, 1), y.shape
    assert jnp.allclose(y, y_ref, atol=2e-3, rtol=2e-3), "mismatch vs reference"

    print("KERNEL_OK")
</pallas_src>

<mosaic_0001>
module attributes {stable_mosaic.version = 11 : i64} {
  func.func @mlp_kernel(%arg0: i32, %arg1: memref<8x128xbf16, #tpu.memory_space<vmem>>, %arg2: memref<128x256xbf16, #tpu.memory_space<vmem>>, %arg3: memref<1x256xf32, #tpu.memory_space<vmem>>, %arg4: memref<256x256xbf16, #tpu.memory_space<vmem>>, %arg5: memref<1x256xf32, #tpu.memory_space<vmem>>, %arg6: memref<256x8xbf16, #tpu.memory_space<vmem>>, %arg7: memref<1xf32, #tpu.memory_space<smem>>, %arg8: memref<8x8xf32, #tpu.memory_space<vmem>>) attributes {dimension_semantics = [#tpu.dimension_semantics<parallel>], iteration_bounds = array<i64: 2>, scalar_prefetch = 0 : i64, scratch_operands = 0 : i64, tpu.core_type = #tpu.core_type<tc>, window_params = [{transform_indices = @transform_0, window_bounds = array<i64: 8, 128>}, {pipeline_mode = #tpu.pipeline_mode<synchronous>, transform_indices = @transform_1, window_bounds = array<i64: 128, 256>}, {pipeline_mode = #tpu.pipeline_mode<synchronous>, transform_indices = @transform_2, window_bounds = array<i64: 1, 256>}, {pipeline_mode = #tpu.pipeline_mode<synchronous>, transform_indices = @transform_3, window_bounds = array<i64: 256, 256>}, {pipeline_mode = #tpu.pipeline_mode<synchronous>, transform_indices = @transform_4, window_bounds = array<i64: 1, 256>}, {pipeline_mode = #tpu.pipeline_mode<synchronous>, transform_indices = @transform_5, window_bounds = array<i64: 256, 8>}, {transform_indices = @transform_6, window_bounds = array<i64: 1>}, {transform_indices = @transform_7, window_bounds = array<i64: 8, 8>}]} {
    %c0 = arith.constant 0 : index
    %c0_0 = arith.constant 0 : index
    %0 = vector.load %arg1[%c0, %c0_0] : memref<8x128xbf16, #tpu.memory_space<vmem>>, vector<8x128xbf16>
    %c0_1 = arith.constant 0 : index
    %c0_2 = arith.constant 0 : index
    %1 = vector.load %arg2[%c0_1, %c0_2] : memref<128x256xbf16, #tpu.memory_space<vmem>>, vector<128x256xbf16>
    %cst = arith.constant dense<0.000000e+00> : vector<8x256xf32>
    %2 = tpu.matmul %0, %1, %cst {dimension_numbers = #tpu.dot_dimension_numbers<[1], [0], [0], [1], [0, 0, 1, 1], [], []>} : vector<8x128xbf16>, vector<128x256xbf16>, vector<8x256xf32> -> vector<8x256xf32>
    %c0_3 = arith.constant 0 : index
    %c0_4 = arith.constant 0 : index
    %3 = vector.load %arg3[%c0_3, %c0_4] : memref<1x256xf32, #tpu.memory_space<vmem>>, vector<1x256xf32>
    %4 = vector.broadcast %3 : vector<1x256xf32> to vector<8x256xf32>
    %5 = arith.addf %2, %4 : vector<8x256xf32>
    %cst_5 = arith.constant 0.000000e+00 : f32
    %6 = vector.broadcast %cst_5 : f32 to vector<8x256xf32>
    %7 = arith.maximumf %5, %6 : vector<8x256xf32>
    %8 = arith.truncf %7 : vector<8x256xf32> to vector<8x256xbf16>
    %c0_6 = arith.constant 0 : index
    %c0_7 = arith.constant 0 : index
    %9 = vector.load %arg4[%c0_6, %c0_7] : memref<256x256xbf16, #tpu.memory_space<vmem>>, vector<256x256xbf16>
    %cst_8 = arith.constant dense<0.000000e+00> : vector<8x256xf32>
    %10 = tpu.matmul %8, %9, %cst_8 {dimension_numbers = #tpu.dot_dimension_numbers<[1], [0], [0], [1], [0, 0, 1, 1], [], []>} : vector<8x256xbf16>, vector<256x256xbf16>, vector<8x256xf32> -> vector<8x256xf32>
    %c0_9 = arith.constant 0 : index
    %c0_10 = arith.constant 0 : index
    %11 = vector.load %arg5[%c0_9, %c0_10] : memref<1x256xf32, #tpu.memory_space<vmem>>, vector<1x256xf32>
    %12 = vector.broadcast %11 : vector<1x256xf32> to vector<8x256xf32>
    %13 = arith.addf %10, %12 : vector<8x256xf32>
    %cst_11 = arith.constant 0.000000e+00 : f32
    %14 = vector.broadcast %cst_11 : f32 to vector<8x256xf32>
    %15 = arith.maximumf %13, %14 : vector<8x256xf32>
    %16 = arith.truncf %15 : vector<8x256xf32> to vector<8x256xbf16>
    %c0_12 = arith.constant 0 : index
    %c0_13 = arith.constant 0 : index
    %17 = vector.load %arg6[%c0_12, %c0_13] : memref<256x8xbf16, #tpu.memory_space<vmem>>, vector<256x8xbf16>
    %cst_14 = arith.constant dense<0.000000e+00> : vector<8x8xf32>
    %18 = tpu.matmul %16, %17, %cst_14 {dimension_numbers = #tpu.dot_dimension_numbers<[1], [0], [0], [1], [0, 0, 1, 1], [], []>} : vector<8x256xbf16>, vector<256x8xbf16>, vector<8x8xf32> -> vector<8x8xf32>
    %c0_15 = arith.constant 0 : index
    %19 = memref.load %arg7[%c0_15] : memref<1xf32, #tpu.memory_space<smem>>
    %20 = vector.broadcast %19 : f32 to vector<8x8xf32>
    %21 = arith.addf %18, %20 : vector<8x8xf32>
    %c0_16 = arith.constant 0 : index
    %c0_17 = arith.constant 0 : index
    %22 = vector.load %arg8[%c0_16, %c0_17] : memref<8x8xf32, #tpu.memory_space<vmem>>, vector<8x8xf32>
    tpu.vector_store %arg8[%c0_16, %c0_17], %21 {strides = array<i32>} : memref<8x8xf32, #tpu.memory_space<vmem>>, vector<8x8xf32>,
    return
  }
  func.func @transform_0(%arg0: i32) -> (i32, i32) {
    %c0_i32 = arith.constant 0 : i32
    %c0_i32_0 = arith.constant 0 : i32
    return %arg0, %c0_i32 : i32, i32
  }
  func.func @transform_1(%arg0: i32) -> (i32, i32) {
    %c0_i32 = arith.constant 0 : i32
    %c0_i32_0 = arith.constant 0 : i32
    %c0_i32_1 = arith.constant 0 : i32
    return %c0_i32, %c0_i32_0 : i32, i32
  }
  func.func @transform_2(%arg0: i32) -> (i32, i32) {
    %c0_i32 = arith.constant 0 : i32
    %c0_i32_0 = arith.constant 0 : i32
    %c0_i32_1 = arith.constant 0 : i32
    return %c0_i32, %c0_i32_0 : i32, i32
  }
  func.func @transform_3(%arg0: i32) -> (i32, i32) {
    %c0_i32 = arith.constant 0 : i32
    %c0_i32_0 = arith.constant 0 : i32
    %c0_i32_1 = arith.constant 0 : i32
    return %c0_i32, %c0_i32_0 : i32, i32
  }
  func.func @transform_4(%arg0: i32) -> (i32, i32) {
    %c0_i32 = arith.constant 0 : i32
    %c0_i32_0 = arith.constant 0 : i32
    %c0_i32_1 = arith.constant 0 : i32
    return %c0_i32, %c0_i32_0 : i32, i32
  }
  func.func @transform_5(%arg0: i32) -> (i32, i32) {
    %c0_i32 = arith.constant 0 : i32
    %c0_i32_0 = arith.constant 0 : i32
    %c0_i32_1 = arith.constant 0 : i32
    return %c0_i32, %c0_i32_0 : i32, i32
  }
  func.func @transform_6(%arg0: i32) -> i32 {
    %c0_i32 = arith.constant 0 : i32
    %c0_i32_0 = arith.constant 0 : i32
    return %c0_i32 : i32
  }
  func.func @transform_7(%arg0: i32) -> (i32, i32) {
    %c0_i32 = arith.constant 0 : i32
    %c0_i32_0 = arith.constant 0 : i32
    return %arg0, %c0_i32 : i32, i32
  }
}

</mosaic_0001>

<bundles_post_ra>
// kernel: mlp_forward.1
= control target key start
LH: loop header
LB: loop body
LE: loop exit
PB: predicated region body
PF: predicated region fallthrough
CT: control target
= control target key end

     0   :  { %s1148_s26 = smov 0   ;;  %s1371_s0 = inlined_call_operand.vmem [shape: bf16[16,128], index: 0, kind: input, shape index: {}]   ;;  %s1372_s1 = inlined_call_operand.vmem [shape: bf16[128,256], index: 1, kind: input, shape index: {}]   ;;  %s1373_s2 = inlined_call_operand.vmem [shape: f32[1,256], index: 2, kind: input, shape index: {}]   ;;  %s1374_s3 = inlined_call_operand.vmem [shape: bf16[256,256], index: 3, kind: input, shape index: {}]   ;;  %s1375_s4 = inlined_call_operand.vmem [shape: f32[1,256], index: 4, kind: input, shape index: {}]   ;;  %s1376_s5 = inlined_call_operand.vmem [shape: bf16[256,8], index: 5, kind: input, shape index: {}]   ;;  %s1377_s6 = inlined_call_operand.<no memory space> [shape: f32[1], index: 6, kind: input, shape index: {}]   ;;  %s1378_s7 = inlined_call_operand.vmem [shape: f32[16,8], index: 7, kind: output, shape index: {}]  }
   0x1   :  { %12 = sst [smem:[#allocation2]] %s1377_s6 }
   0x2 LB: > { %s904_s27 = sadd.s32 4294967295, %s1102_s26   ;;  %p908_p0 = scmp.ge.s32.totalorder %s1102_s26, 1  ;;  %s1102_s26 = sphi %s1148_s26, %s18_s26  }
   0x3   : > { %p237_p1 = scmp.lt.s32.totalorder %s1102_s26, 3 }
   0x5   : > { %p238_p2 = pnand %p908_p0, %p237_p1 }
   0x6   : > { %v1008_v0 = vld [vmem:[%s1372_s1 + $0x4] ss:$8 sps:$4 sm:$0xff] (!%p238_p2)   ;;  %v1010_v1 = vld [vmem:[%s1372_s1] ss:$8 sps:$4 sm:$0xff] (!%p238_p2)   ;;  %v1104_v2 = vmov (!%p238_p2), 0   ;;  %p267_p3 = scmp.lt.s32.totalorder (!%p238_p2), %s904_s27, 1  ;;  %v295_v62 = vlaneseq (!%p238_p2) }
   0x7   : > { %241 = sbr.rel (%p238_p2) target bundleno = 697 (0x2b9), region = 48  ;;  %417 = vmatprep.mubr.bf16.mxu0 (!%p238_p2), %v1104_v2  ;;  %385 = vmatprep.subr.bf16.mxu0 (!%p238_p2), %v1008_v0  ;;  %v1011_v3 = vld [vmem:[%s1372_s1 + $0x14] ss:$8 sps:$4 sm:$0xff] (!%p238_p2)   ;;  %v1013_v4 = vld [vmem:[%s1372_s1 + $0x10] ss:$8 sps:$4 sm:$0xff] (!%p238_p2)   ;;  %v1080_v50 = vld [vmem:[%s1376_s5 + $0x40] sm:$0xff] (!%p238_p2)  }
   0x8   : > { %386 = vmatpush1.bf16.msra.mxu0 (!%p238_p2), %v1010_v1  ;;  %v1014_v5 = vld [vmem:[%s1372_s1 + $0x24] ss:$8 sps:$4 sm:$0xff] (!%p238_p2)   ;;  %v1016_v6 = vld [vmem:[%s1372_s1 + $0x20] ss:$8 sps:$4 sm:$0xff] (!%p238_p2)   ;;  %v1017_v7 = vld [vmem:[%s1372_s1 + $0x34] ss:$8 sps:$4 sm:$0xff] (!%p238_p2)  }
   0x9   : > { %387 = vmatprep.subr.bf16.mxu0 (!%p238_p2), %v1011_v3  ;;  %v1019_v8 = vld [vmem:[%s1372_s1 + $0x30] ss:$8 sps:$4 sm:$0xff] (!%p238_p2)   ;;  %v1020_v9 = vld [vmem:[%s1372_s1 + $0x44] ss:$8 sps:$4 sm:$0xff] (!%p238_p2)   ;;  %v1034_v11 = vld [vmem:[%s1374_s3] ss:$8 sps:$4 sm:$0xff] (!%p238_p2)  }
   0xa   : > { %v1032_v10 = vld [vmem:[%s1374_s3 + $0x4] ss:$8 sps:$4 sm:$0xff] (!%p238_p2)   ;;  %v1035_v12 = vld [vmem:[%s1374_s3 + $0x14] ss:$8 sps:$4 sm:$0xff] (!%p238_p2)   ;;  %v1022_v13 = vld [vmem:[%s1372_s1 + $0x40] ss:$8 sps:$4 sm:$0xff] (!%p238_p2)  }
   0xb   : > { %634 = vmatprep.subr.bf16.mxu1 (!%p238_p2), %v1032_v10  ;;  %v1037_v14 = vld [vmem:[%s1374_s3 + $0x10] ss:$8 sps:$4 sm:$0xff] (!%p238_p2)   ;;  %v1038_v15 = vld [vmem:[%s1374_s3 + $0x24] ss:$8 sps:$4 sm:$0xff] (!%p238_p2)   ;;  %v1023_v16 = vld [vmem:[%s1372_s1 + $0x54] ss:$8 sps:$4 sm:$0xff] (!%p238_p2)  }
   0xc   : > { %388 = vmatpush1.bf16.msra.mxu0 (!%p238_p2), %v1013_v4  ;;  %635 = vmatpush1.bf16.msra.mxu1 (!%p238_p2), %v1034_v11  ;;  %v1025_v17 = vld [vmem:[%s1372_s1 + $0x50] ss:$8 sps:$4 sm:$0xff] (!%p238_p2)   ;;  %v1040_v18 = vld [vmem:[%s1374_s3 + $0x20] ss:$8 sps:$4 sm:$0xff] (!%p238_p2)   ;;  %v1041_v19 = vld [vmem:[%s1374_s3 + $0x34] ss:$8 sps:$4 sm:$0xff] (!%p238_p2)  }
   0xd   : > { %389 = vmatprep.subr.bf16.mxu0 (!%p238_p2), %v1014_v5  ;;  %636 = vmatprep.subr.bf16.mxu1 (!%p238_p2), %v1035_v12  ;;  %v1026_v20 = vld [vmem:[%s1372_s1 + $0x64] ss:$8 sps:$4 sm:$0xff] (!%p238_p2)   ;;  %v1028_v21 = vld [vmem:[%s1372_s1 + $0x60] ss:$8 sps:$4 sm:$0xff] (!%p238_p2)   ;;  %v1043_v22 = vld [vmem:[%s1374_s3 + $0x30] ss:$8 sps:$4 sm:$0xff] (!%p238_p2)  }
   0xe   : > { %s1380_s27 = smov (!%p267_p3, %s904_s27), 1  ;;  %v1044_v23 = vld [vmem:[%s1374_s3 + $0x44] ss:$8 sps:$4 sm:$0xff]   ;;  %v1029_v24 = vld [vmem:[%s1372_s1 + $0x74] ss:$8 sps:$4 sm:$0xff]   ;;  %v296_v63 = vshrl.u32 %v295_v62, 7 }
   0xf   : > { %s909_s28 = sshll.u32 %s1380_s27, 2  ;;  %v1031_v25 = vld [vmem:[%s1372_s1 + $0x70] ss:$8 sps:$4 sm:$0xff]   ;;  %v1046_v26 = vld [vmem:[%s1374_s3 + $0x40] ss:$8 sps:$4 sm:$0xff]   ;;  %s711_s8 = sld [smem:[#allocation2]] }
  0x10   : > { %390 = vmatpush1.bf16.msra.mxu0 %v1016_v6  ;;  %637 = vmatpush1.bf16.msra.mxu1 %v1037_v14  ;;  %s270_s13 = scalar_lea.vmem %s1371_s0, %s909_s28  ;;  %v1047_v27 = vld [vmem:[%s1374_s3 + $0x54] ss:$8 sps:$4 sm:$0xff]   ;;  %v1049_v29 = vld [vmem:[%s1374_s3 + $0x50] ss:$8 sps:$4 sm:$0xff]   ;;  %v1050_v30 = vld [vmem:[%s1374_s3 + $0x64] ss:$8 sps:$4 sm:$0xff]  }
  0x11   : > { %391 = vmatprep.subr.bf16.mxu0 %v1017_v7  ;;  %638 = vmatprep.subr.bf16.mxu1 %v1038_v15  ;;  %v276_v28 = vld [vmem:[%s270_s13] sm:$0xf]  ;;  %v1053_v32 = vld [vmem:[%s1374_s3 + $0x74] ss:$8 sps:$4 sm:$0xff]   ;;  %v1055_v33 = vld [vmem:[%s1374_s3 + $0x70] ss:$8 sps:$4 sm:$0xff]  }
  0x12   : > { %v1052_v31 = vld [vmem:[%s1374_s3 + $0x60] ss:$8 sps:$4 sm:$0xff]   ;;  %v1056_v34 = vld [vmem:[%s1374_s3 + $0x84] ss:$8 sps:$4 sm:$0xff]   ;;  %v1059_v36 = vld [vmem:[%s1374_s3 + $0x94] ss:$8 sps:$4 sm:$0xff]  }
  0x13   : > { %v1058_v35 = vld [vmem:[%s1374_s3 + $0x80] ss:$8 sps:$4 sm:$0xff]   ;;  %v1061_v37 = vld [vmem:[%s1374_s3 + $0x90] ss:$8 sps:$4 sm:$0xff]   ;;  %v1062_v38 = vld [vmem:[%s1374_s3 + $0xa4] ss:$8 sps:$4 sm:$0xff]  }
  0x14   : > { %392 = vmatpush1.bf16.msra.mxu0 %v1019_v8  ;;  %639 = vmatpush1.bf16.msra.mxu1 %v1040_v18  ;;  %v1064_v39 = vld [vmem:[%s1374_s3 + $0xa0] ss:$8 sps:$4 sm:$0xff]   ;;  %v1065_v40 = vld [vmem:[%s1374_s3 + $0xb4] ss:$8 sps:$4 sm:$0xff]   ;;  %v1067_v41 = vld [vmem:[%s1374_s3 + $0xb0] ss:$8 sps:$4 sm:$0xff]  }
  0x15   : > { %393 = vmatprep.subr.bf16.mxu0 %v1020_v9  ;;  %640 = vmatprep.subr.bf16.mxu1 %v1041_v19  ;;  %v1068_v42 = vld [vmem:[%s1374_s3 + $0xc4] ss:$8 sps:$4 sm:$0xff]   ;;  %v1070_v43 = vld [vmem:[%s1374_s3 + $0xc0] ss:$8 sps:$4 sm:$0xff]   ;;  %v1071_v44 = vld [vmem:[%s1374_s3 + $0xd4] ss:$8 sps:$4 sm:$0xff]  }
  0x16   : > { %v1073_v45 = vld [vmem:[%s1374_s3 + $0xd0] ss:$8 sps:$4 sm:$0xff]   ;;  %v1074_v46 = vld [vmem:[%s1374_s3 + $0xe4] ss:$8 sps:$4 sm:$0xff]   ;;  %v1076_v47 = vld [vmem:[%s1374_s3 + $0xe0] ss:$8 sps:$4 sm:$0xff]  }
  0x17   : > { %v1077_v48 = vld [vmem:[%s1374_s3 + $0xf4] ss:$8 sps:$4 sm:$0xff]   ;;  %v1079_v49 = vld [vmem:[%s1374_s3 + $0xf0] ss:$8 sps:$4 sm:$0xff]   ;;  %v1081_v51 = vld [vmem:[%s1376_s5] sm:$0xff]   ;;  %v297_v0 = vsub.s32 0, %v296_v63 }
  0x18   : > { %394 = vmatpush1.bf16.msra.mxu0 %v1022_v13  ;;  %641 = vmatpush1.bf16.msra.mxu1 %v1043_v22  ;;  %v1082_v52 = vld [vmem:[%s1376_s5 + $0x48] sm:$0xff]   ;;  %v1084_v54 = vld [vmem:[%s1376_s5 + $0x50] sm:$0xff]   ;;  %v1086_v56 = vld [vmem:[%s1376_s5 + $0x58] sm:$0xff]   ;;  %v301_v2 = vsub.s32 1, %v296_v63  ;;  %s910_s9 = sshll.u32 %s1380_s27, 3  ;;  %vm849_vm0 = vcmask 64512  }
  0x19   : > { %395 = vmatprep.subr.bf16.mxu0 %v1023_v16  ;;  %642 = vmatprep.subr.bf16.mxu1 %v1044_v23  ;;  %v1083_v53 = vld [vmem:[%s1376_s5 + $0x8] sm:$0xff]   ;;  %v1085_v55 = vld [vmem:[%s1376_s5 + $0x10] sm:$0xff]   ;;  %v1087_v57 = vld [vmem:[%s1376_s5 + $0x18] sm:$0xff]   ;;  %s274_s12 = scalar_lea.vmem %s1378_s7, %s910_s9 }
  0x1a   : > { %v1088_v58 = vld [vmem:[%s1376_s5 + $0x60] sm:$0xff]   ;;  %v1090_v60 = vld [vmem:[%s1376_s5 + $0x68] sm:$0xff]   ;;  %v1092_v15 = vld [vmem:[%s1376_s5 + $0x70] sm:$0xff]  }
  0x1b   : > { %v1089_v59 = vld [vmem:[%s1376_s5 + $0x20] sm:$0xff]   ;;  %v1091_v61 = vld [vmem:[%s1376_s5 + $0x28] sm:$0xff]   ;;  %v1093_v16 = vld [vmem:[%s1376_s5 + $0x30] sm:$0xff]  }
  0x1c   : > { %396 = vmatpush1.bf16.msra.mxu0 %v1025_v17  ;;  %643 = vmatpush1.bf16.msra.mxu1 %v1046_v26  ;;  %v293_v1 = vld [vmem:[%s1373_s2] sm:$0x3]  ;;  %v1094_v17 = vld [vmem:[%s1376_s5 + $0x78] sm:$0xff]  }
  0x1d   : > { %397 = vmatprep.subr.bf16.mxu0 %v1026_v20  ;;  %644 = vmatprep.subr.bf16.mxu1 %v1047_v27  ;;  %v298_v3 = vrot.slane %v293_v1, %v297_v0  ;;  %v302_v4 = vrot.slane %v293_v1, %v301_v2  ;;  %v1095_v18 = vld [vmem:[%s1376_s5 + $0x38] sm:$0xff]   ;;  %v462_v19 = vld [vmem:[%s1375_s4] sm:$0x3] }
  0x1e   : > { %v467_v20 = vrot.slane %v462_v19, %v297_v0 }
  0x20   : > { %398 = vmatpush1.bf16.msra.mxu0 %v1028_v21  ;;  %645 = vmatpush1.bf16.msra.mxu1 %v1049_v29  ;;  %v471_v21 = vrot.slane %v462_v19, %v301_v2 }
  0x21   : > { %399 = vmatprep.subr.bf16.mxu0 %v1029_v24  ;;  %646 = vmatprep.subr.bf16.mxu1 %v1050_v30 }
  0x24   : > { %400 = vmatpush1.bf16.msra.mxu0 %v1031_v25  ;;  %647 = vmatpush1.bf16.msra.mxu1 %v1052_v31 }
  0x25   : > { %648 = vmatprep.subr.bf16.mxu1 %v1053_v32  ;;  %977 = vmatprep.subr.bf16.mxu0 %v1080_v50 }
  0x27   : > { %418 = vmatmul.mubr.bf16.vlgmr.msra.gmra.mrb[0].mxu0 %v276_v28 }
  0x28   : > { %649 = vmatpush1.bf16.msra.mxu1 %v1055_v33  ;;  %978 = vmatpush3.bf16.msra.mxu0 %v1081_v51  ;;  %v712_v33 = vstv %s711_s8 }
  0x29   : > { %650 = vmatprep.subr.bf16.mxu1 %v1056_v34  ;;  %979 = vmatprep.subr.bf16.mxu0 %v1082_v52 }
  0x2c   : > { %651 = vmatpush1.bf16.msra.mxu1 %v1058_v35  ;;  %980 = vmatpush3.bf16.msra.mxu0 %v1083_v53 }
  0x2d   : > { %652 = vmatprep.subr.bf16.mxu1 %v1059_v36  ;;  %981 = vmatprep.subr.bf16.mxu0 %v1084_v54 }
  0x30   : > { %653 = vmatpush1.bf16.msra.mxu1 %v1061_v37  ;;  %982 = vmatpush3.bf16.msra.mxu0 %v1085_v55 }
  0x31   : > { %654 = vmatprep.subr.bf16.mxu1 %v1062_v38  ;;  %983 = vmatprep.subr.bf16.mxu0 %v1086_v56 }
  0x34   : > { %655 = vmatpush1.bf16.msra.mxu1 %v1064_v39  ;;  %984 = vmatpush3.bf16.msra.mxu0 %v1087_v57 }
  0x35   : > { %656 = vmatprep.subr.bf16.mxu1 %v1065_v40  ;;  %985 = vmatprep.subr.bf16.mxu0 %v1088_v58 }
  0x38   : > { %657 = vmatpush1.bf16.msra.mxu1 %v1067_v41  ;;  %986 = vmatpush3.bf16.msra.mxu0 %v1089_v59 }
  0x39   : > { %658 = vmatprep.subr.bf16.mxu1 %v1068_v42  ;;  %987 = vmatprep.subr.bf16.mxu0 %v1090_v60 }
  0x3c   : > { %659 = vmatpush1.bf16.msra.mxu1 %v1070_v43  ;;  %988 = vmatpush3.bf16.msra.mxu0 %v1091_v61 }
  0x3d   : > { %660 = vmatprep.subr.bf16.mxu1 %v1071_v44  ;;  %989 = vmatprep.subr.bf16.mxu0 %v1092_v15 }
  0x40   : > { %661 = vmatpush1.bf16.msra.mxu1 %v1073_v45  ;;  %990 = vmatpush3.bf16.msra.mxu0 %v1093_v16 }
  0x41   : > { %662 = vmatprep.subr.bf16.mxu1 %v1074_v46  ;;  %991 = vmatprep.subr.bf16.mxu0 %v1094_v17 }
  0x44   : > { %663 = vmatpush1.bf16.msra.mxu1 %v1076_v47  ;;  %992 = vmatpush3.bf16.msra.mxu0 %v1095_v18 }
  0x45   : > { %664 = vmatprep.subr.bf16.mxu1 %v1077_v48 }
  0x48   : > { %665 = vmatpush1.bf16.msra.mxu1 %v1079_v49 }
  0xfa   : > { %v419_v5 = vpop.f32.mrb[0].mxu0 }
  0xfb   : > { %v420_v6 = vadd.f32 %v419_v5, %v298_v3  ;;  %v421_v7 = vpop.f32.mrb[1].mxu0 }
  0xfc   : > { %v422_v8 = vadd.f32 %v421_v7, %v302_v4  ;;  %v423_v9 = vpop.f32.mrb[2].mxu0 }
  0xfd   : > { %v426_v10 = vmax.f32 %v420_v6, 0.0  ;;  %v424_v11 = vpop.f32.mrb[3].mxu0 }
  0xfe   : > { %v427_v12 = vmax.f32 %v422_v8, 0.0 }
  0xff   : > { %v428_v14 = vpack.c.bf16 %v426_v10, %v426_v10 }
 0x100   : > { %v429_v13 = vpack.c.bf16 %v427_v12, %v427_v12 }
 0x102   : > { %666 = vmatprep.mubr.bf16.mxu1 %v429_v13 }
 0x103   : > { %667 = vmatmul.mubr.bf16.vlgmr.msra.gmra.mrb[0].mxu1 %v428_v14 }
 0x1d6   : > { %v668_v22 = vpop.f32.mrb[0].mxu1 }
 0x1d7   : > { %v669_v23 = vadd.f32 %v668_v22, %v467_v20  ;;  %v670_v24 = vpop.f32.mrb[1].mxu1 }
 0x1d8   : > { %v671_v25 = vadd.f32 %v670_v24, %v471_v21  ;;  %v672_v26 = vpop.f32.mrb[2].mxu1 }
 0x1d9   : > { %v675_v27 = vmax.f32 %v669_v23, 0.0  ;;  %v673_v28 = vpop.f32.mrb[3].mxu1 }
 0x1da   : > { %v676_v29 = vmax.f32 %v671_v25, 0.0 }
 0x1db   : > { %v677_v31 = vpack.c.bf16 %v675_v27, %v675_v27 }
 0x1dc   : > { %v678_v30 = vpack.c.bf16 %v676_v29, %v676_v29 }
 0x1de   : > { %841 = vmatprep.mubr.bf16.mxu0 %v678_v30 }
 0x1df   : > { %842 = vmatmul.mubr.bf16.vlgmr.msra.gmra.mrb[4].mxu0 %v677_v31 }
 0x2b2   : > { %v993_v32 = vpop.f32.mrb[4].mxu0 }
 0x2b3   : > { %v994_v34 = vpop.f32.mrb[5].mxu0 }
 0x2b4   : > { %v995_v35 = vadd.f32 %v994_v34, %v993_v32  ;;  %v996_v36 = vpop.f32.mrb[6].mxu0 }
 0x2b5   : > { %v997_v37 = vpop.f32.mrb[7].mxu0 }
 0x2b6   : > { %v844_v38 = vadd.f32 %v995_v35, %v712_v33 }
 0x2b8   : > { %850 = vst.msk [vmem:[%s274_s12] sm:$0xff] %vm849_vm0, %v844_v38 }
 0x2b9 PF: > { %s18_s26 = sadd.s32 1, %s1102_s26  }
 0x2ba   : > { %p15_p4 = scmp.ge.s32.totalorder %s18_s26, 4  }
 0x2bc   :  { %17 = sbr.rel (!%p15_p4) target bundleno = 2 (0x2), region = 78 }

</bundles_post_ra>
